<compile_context>
chip_gen: v7x
topology: tpu7x:2x2x1
jax: 0.10.0
libtpu: 0.0.40
codegen_flags: <defaults>
</compile_context>

<pallas_src>
import math
import numpy as np
import jax
import jax.numpy as jnp
from jax.experimental import pallas as pl
from jax.experimental.pallas import tpu as pltpu

CLIP_LEN = 4

# ----- deterministic "parameters" (exactly as in CompressSimulator.__init__) -----
W_JPEG = 0.333
W_GAUSS3D = 0.333
W_GAUSS2D = 0.333

# Standard JPEG quantization tables (same as DiffJPEG).
Y_TABLE = np.array(
    [[16, 11, 10, 16, 24, 40, 51, 61],
     [12, 12, 14, 19, 26, 58, 60, 55],
     [14, 13, 16, 24, 40, 57, 69, 56],
     [14, 17, 22, 29, 51, 87, 80, 62],
     [18, 22, 37, 56, 68, 109, 103, 77],
     [24, 35, 55, 64, 81, 104, 113, 92],
     [49, 64, 78, 87, 103, 121, 120, 101],
     [72, 92, 95, 98, 112, 100, 103, 99]], dtype=np.float32)

C_TABLE = np.full((8, 8), 99.0, dtype=np.float32)
C_TABLE[:4, :4] = np.array(
    [[17, 18, 24, 47],
     [18, 21, 26, 66],
     [24, 26, 56, 99],
     [47, 66, 99, 99]], dtype=np.float32)


def _gauss1d(size, sigma):
    xs = np.arange(size, dtype=np.float64) - (size - 1) / 2.0
    g = np.exp(-(xs ** 2) / (2.0 * sigma ** 2))
    return (g / g.sum()).astype(np.float32)


G3 = _gauss1d(3, 0.8)   # temporal taps of the separable (3,5,5) blur
G5 = _gauss1d(5, 0.8)   # spatial taps shared by the 2D and 3D blurs


def _dct8():
    d = np.zeros((8, 8), np.float64)
    for u in range(8):
        cu = math.sqrt(1.0 / 8.0) if u == 0 else math.sqrt(2.0 / 8.0)
        for xx in range(8):
            d[u, xx] = cu * math.cos((2 * xx + 1) * u * math.pi / 16.0)
    return d.astype(np.float32)


def _band_matrix(n, k1d):
    """(M @ x)[i] = sum_d k1d[d+r] * x[i+d]  with zero 'same' padding."""
    r = len(k1d) // 2
    m = np.zeros((n, n), np.float32)
    for d in range(-r, r + 1):
        idx = np.arange(max(0, -d), min(n, n - d))
        m[idx, idx + d] = float(k1d[d + r])
    return m


# ------------------------------ fused forward --------------------------------
def compress_simulator(x, key, clip_len=CLIP_LEN):
    """Forward of CompressSimulator.  x: (B, 3*clip_len, H, W) float32 in [0,1]."""
    B, C, H, W = x.shape
    T = clip_len
    assert C == 3 * T and H % 8 == 0 and W % 8 == 0

    # r = torch.randint(0, 3, [1])  ->  pick quality among {90, 80, 70}.
    r = jax.random.randint(key, (), 0, 3)
    factors = jnp.array([(200.0 - 2.0 * q) / 100.0 for q in (90.0, 80.0, 70.0)],
                        jnp.float32)
    factor = jnp.take(factors, r)

    # Quantization tables (and exact reciprocals) tiled over the frame.
    qy = jnp.tile(jnp.asarray(Y_TABLE), (H // 8, W // 8)) * factor    # (H, W)
    qc = jnp.tile(jnp.asarray(C_TABLE), (H // 8, W // 8)) * factor
    qyi = 1.0 / qy
    qci = 1.0 / qc

    # Block-diagonal 8x8 DCT matrices (bf16 for MXU) — pre-transposed on host.
    d8 = _dct8()
    dh = np.kron(np.eye(H // 8, dtype=np.float32), d8)                # (H, H)
    dw = np.kron(np.eye(W // 8, dtype=np.float32), d8)                # (W, W)
    dh_bf = jnp.asarray(dh, jnp.bfloat16)
    dht_bf = jnp.asarray(dh.T, jnp.bfloat16)
    dwt_bf = jnp.asarray(dw.T, jnp.bfloat16)
    dw_bf = jnp.asarray(dw, jnp.bfloat16)

    # Banded matrices for the separable 5x5 spatial blur (zero 'same' padding).
    bh = jnp.asarray(_band_matrix(H, G5))          # vertical:   BH @ img
    bw = jnp.asarray(_band_matrix(W, G5).T)        # horizontal: img @ BW

    g3_0, g3_1, g3_2 = float(G3[0]), float(G3[1]), float(G3[2])

    def kernel(xc_ref, xp_ref, xn_ref,
               dh_ref, dht_ref, dwt_ref, dw_ref,
               bh_ref, bw_ref,
               qy_ref, qc_ref, qyi_ref, qci_ref,
               o_ref):
        t = pl.program_id(1)

        cur = xc_ref[0].astype(jnp.float32)                           # (3, H, W)
        m_prev = (t > 0).astype(jnp.float32)                          # zero temporal pad
        m_next = (t < T - 1).astype(jnp.float32)
        prev = xp_ref[0].astype(jnp.float32) * m_prev
        nxt = xn_ref[0].astype(jnp.float32) * m_next

        # Temporal pass of the separable 3D blur, fused with the 2D-blur weight;
        # the shared 5x5 spatial blur is applied once below via MXU banded matmuls.
        blend = (W_GAUSS3D * (g3_0 * prev + g3_1 * cur + g3_2 * nxt)
                 + W_GAUSS2D * cur)

        # -------- DiffJPEG (4:4:4) on the current frame --------
        img = cur * 255.0
        rr_, gg_, bb_ = img[0], img[1], img[2]
        ycc = (
            0.299 * rr_ + 0.587 * gg_ + 0.114 * bb_ - 128.0,          # Y  - 128
            -0.168736 * rr_ - 0.331264 * gg_ + 0.5 * bb_,             # Cb (centered)
            0.5 * rr_ - 0.418688 * gg_ - 0.081312 * bb_,              # Cr (centered)
        )
        qt = (qy_ref[...], qc_ref[...], qc_ref[...])
        qti = (qyi_ref[...], qci_ref[...], qci_ref[...])
        dh_m, dht_m = dh_ref[...], dht_ref[...]
        dwt_m, dw_m = dwt_ref[...], dw_ref[...]

        rec = []
        for ci in range(3):
            comp = ycc[ci].astype(jnp.bfloat16)
            t1 = jnp.dot(dh_m, comp, preferred_element_type=jnp.float32)
            dct = jnp.dot(t1.astype(jnp.bfloat16), dwt_m,
                          preferred_element_type=jnp.float32)
            scaled = dct * qti[ci]                                    # reciprocal multiply
            rounded = jnp.round(scaled)
            qcoef = rounded + (scaled - rounded) ** 3                 # differentiable round
            deq = (qcoef * qt[ci]).astype(jnp.bfloat16)
            t2 = jnp.dot(dht_m, deq, preferred_element_type=jnp.float32)
            rec.append(jnp.dot(t2.astype(jnp.bfloat16), dw_m,
                               preferred_element_type=jnp.float32))
        yrec = rec[0] + 128.0
        cbrec, crrec = rec[1], rec[2]
        jpeg_rgb = (
            yrec + 1.402 * crrec,
            yrec - 0.344136 * cbrec - 0.714136 * crrec,
            yrec + 1.772 * cbrec,
        )

        # -------- shared 5x5 spatial blur + weighted combine --------
        bh_m = bh_ref[...]
        bw_m = bw_ref[...]
        for ci in range(3):
            blur = jnp.dot(bh_m,
                           jnp.dot(blend[ci], bw_m, preferred_element_type=jnp.float32),
                           preferred_element_type=jnp.float32)
            jp = jnp.clip(jpeg_rgb[ci], 0.0, 255.0) * (W_JPEG / 255.0)
            o_ref[0, ci, :, :] = (jp + blur).astype(o_ref.dtype)

    frame_block = (1, 3, H, W)

    def const(shape):
        return pl.BlockSpec(shape, lambda b, ti: (0, 0))

    out = pl.pallas_call(
        kernel,
        out_shape=jax.ShapeDtypeStruct((B, C, H, W), x.dtype),
        grid=(B, T),
        in_specs=[
            # current / previous / next frame views of x (clamped at the edges)
            pl.BlockSpec(frame_block, lambda b, ti: (b, ti, 0, 0)),
            pl.BlockSpec(frame_block, lambda b, ti: (b, jnp.maximum(ti - 1, 0), 0, 0)),
            pl.BlockSpec(frame_block, lambda b, ti: (b, jnp.minimum(ti + 1, T - 1), 0, 0)),
            # DCT / IDCT block-diagonal matrices (bf16)
            const((H, H)), const((H, H)), const((W, W)), const((W, W)),
            # banded spatial-blur matrices (f32)
            const((H, H)), const((W, W)),
            # quant tables and reciprocals
            const((H, W)), const((H, W)), const((H, W)), const((H, W)),
        ],
        out_specs=pl.BlockSpec(frame_block, lambda b, ti: (b, ti, 0, 0)),
        compiler_params=pltpu.CompilerParams(
            dimension_semantics=("parallel", "parallel")),
    )(x, x, x, dh_bf, dht_bf, dwt_bf, dw_bf, bh, bw, qy, qc, qyi, qci)
    return out


if __name__ == "__main__":
    B, T, H, W = 2, CLIP_LEN, 16, 16
    key = jax.random.PRNGKey(0)
    kx, kr = jax.random.split(key)
    x = jax.random.uniform(kx, (B, 3 * T, H, W), dtype=jnp.float32)

    fwd = jax.jit(compress_simulator, static_argnames="clip_len")
    y = fwd(x, kr, clip_len=T)
    y = jax.block_until_ready(y)

    assert y.shape == x.shape and y.dtype == x.dtype
    assert bool(jnp.all(jnp.isfinite(y)))
    print("KERNEL_OK")
</pallas_src>

<mosaic_0001>
module attributes {stable_mosaic.version = 11 : i64} {
  func.func @kernel(%arg0: i32, %arg1: i32, %arg2: memref<1x3x16x16xf32, #tpu.memory_space<vmem>>, %arg3: memref<1x3x16x16xf32, #tpu.memory_space<vmem>>, %arg4: memref<1x3x16x16xf32, #tpu.memory_space<vmem>>, %arg5: memref<16x16xbf16, #tpu.memory_space<vmem>>, %arg6: memref<16x16xbf16, #tpu.memory_space<vmem>>, %arg7: memref<16x16xbf16, #tpu.memory_space<vmem>>, %arg8: memref<16x16xbf16, #tpu.memory_space<vmem>>, %arg9: memref<16x16xf32, #tpu.memory_space<vmem>>, %arg10: memref<16x16xf32, #tpu.memory_space<vmem>>, %arg11: memref<16x16xf32, #tpu.memory_space<vmem>>, %arg12: memref<16x16xf32, #tpu.memory_space<vmem>>, %arg13: memref<16x16xf32, #tpu.memory_space<vmem>>, %arg14: memref<16x16xf32, #tpu.memory_space<vmem>>, %arg15: memref<1x3x16x16xf32, #tpu.memory_space<vmem>>) attributes {dimension_semantics = [#tpu.dimension_semantics<parallel>, #tpu.dimension_semantics<parallel>], iteration_bounds = array<i64: 2, 4>, scalar_prefetch = 0 : i64, scratch_operands = 0 : i64, tpu.core_type = #tpu.core_type<tc>, window_params = [{transform_indices = @transform_0, window_bounds = array<i64: 1, 3, 16, 16>}, {transform_indices = @transform_1, window_bounds = array<i64: 1, 3, 16, 16>}, {transform_indices = @transform_2, window_bounds = array<i64: 1, 3, 16, 16>}, {pipeline_mode = #tpu.pipeline_mode<synchronous>, transform_indices = @transform_3, window_bounds = array<i64: 16, 16>}, {pipeline_mode = #tpu.pipeline_mode<synchronous>, transform_indices = @transform_4, window_bounds = array<i64: 16, 16>}, {pipeline_mode = #tpu.pipeline_mode<synchronous>, transform_indices = @transform_5, window_bounds = array<i64: 16, 16>}, {pipeline_mode = #tpu.pipeline_mode<synchronous>, transform_indices = @transform_6, window_bounds = array<i64: 16, 16>}, {pipeline_mode = #tpu.pipeline_mode<synchronous>, transform_indices = @transform_7, window_bounds = array<i64: 16, 16>}, {pipeline_mode = #tpu.pipeline_mode<synchronous>, transform_indices = @transform_8, window_bounds = array<i64: 16, 16>}, {pipeline_mode = #tpu.pipeline_mode<synchronous>, transform_indices = @transform_9, window_bounds = array<i64: 16, 16>}, {pipeline_mode = #tpu.pipeline_mode<synchronous>, transform_indices = @transform_10, window_bounds = array<i64: 16, 16>}, {pipeline_mode = #tpu.pipeline_mode<synchronous>, transform_indices = @transform_11, window_bounds = array<i64: 16, 16>}, {pipeline_mode = #tpu.pipeline_mode<synchronous>, transform_indices = @transform_12, window_bounds = array<i64: 16, 16>}, {transform_indices = @transform_13, window_bounds = array<i64: 1, 3, 16, 16>}]} {
    %c0 = arith.constant 0 : index
    %c0_0 = arith.constant 0 : index
    %c0_1 = arith.constant 0 : index
    %c0_2 = arith.constant 0 : index
    %0 = vector.load %arg2[%c0, %c0_0, %c0_1, %c0_2] : memref<1x3x16x16xf32, #tpu.memory_space<vmem>>, vector<1x3x16x16xf32>
    %1 = vector.shape_cast %0 : vector<1x3x16x16xf32> to vector<3x16x16xf32>
    %c0_i32 = arith.constant 0 : i32
    %2 = arith.cmpi sgt, %arg1, %c0_i32 : i32
    %3 = arith.extui %2 : i1 to i32
    %4 = arith.sitofp %3 : i32 to f32
    %c3_i32 = arith.constant 3 : i32
    %5 = arith.cmpi slt, %arg1, %c3_i32 : i32
    %6 = arith.extui %5 : i1 to i32
    %7 = arith.sitofp %6 : i32 to f32
    %c0_3 = arith.constant 0 : index
    %c0_4 = arith.constant 0 : index
    %c0_5 = arith.constant 0 : index
    %c0_6 = arith.constant 0 : index
    %8 = vector.load %arg3[%c0_3, %c0_4, %c0_5, %c0_6] : memref<1x3x16x16xf32, #tpu.memory_space<vmem>>, vector<1x3x16x16xf32>
    %9 = vector.shape_cast %8 : vector<1x3x16x16xf32> to vector<3x16x16xf32>
    %10 = vector.broadcast %4 : f32 to vector<3x16x16xf32>
    %11 = arith.mulf %9, %10 : vector<3x16x16xf32>
    %c0_7 = arith.constant 0 : index
    %c0_8 = arith.constant 0 : index
    %c0_9 = arith.constant 0 : index
    %c0_10 = arith.constant 0 : index
    %12 = vector.load %arg4[%c0_7, %c0_8, %c0_9, %c0_10] : memref<1x3x16x16xf32, #tpu.memory_space<vmem>>, vector<1x3x16x16xf32>
    %13 = vector.shape_cast %12 : vector<1x3x16x16xf32> to vector<3x16x16xf32>
    %14 = vector.broadcast %7 : f32 to vector<3x16x16xf32>
    %15 = arith.mulf %13, %14 : vector<3x16x16xf32>
    %cst = arith.constant 0.238994271 : f32
    %16 = vector.broadcast %cst : f32 to vector<3x16x16xf32>
    %17 = arith.mulf %16, %11 : vector<3x16x16xf32>
    %cst_11 = arith.constant 0.522011459 : f32
    %18 = vector.broadcast %cst_11 : f32 to vector<3x16x16xf32>
    %19 = arith.mulf %18, %1 : vector<3x16x16xf32>
    %20 = arith.addf %17, %19 : vector<3x16x16xf32>
    %cst_12 = arith.constant 0.238994271 : f32
    %21 = vector.broadcast %cst_12 : f32 to vector<3x16x16xf32>
    %22 = arith.mulf %21, %15 : vector<3x16x16xf32>
    %23 = arith.addf %20, %22 : vector<3x16x16xf32>
    %cst_13 = arith.constant 3.330000e-01 : f32
    %24 = vector.broadcast %cst_13 : f32 to vector<3x16x16xf32>
    %25 = arith.mulf %24, %23 : vector<3x16x16xf32>
    %cst_14 = arith.constant 3.330000e-01 : f32
    %26 = vector.broadcast %cst_14 : f32 to vector<3x16x16xf32>
    %27 = arith.mulf %26, %1 : vector<3x16x16xf32>
    %28 = arith.addf %25, %27 : vector<3x16x16xf32>
    %cst_15 = arith.constant 2.550000e+02 : f32
    %29 = vector.broadcast %cst_15 : f32 to vector<3x16x16xf32>
    %30 = arith.mulf %1, %29 : vector<3x16x16xf32>
    %31 = vector.extract_strided_slice %30 {offsets = [0, 0, 0], sizes = [1, 16, 16], strides = [1, 1, 1]} : vector<3x16x16xf32> to vector<1x16x16xf32>
    %32 = vector.shape_cast %31 : vector<1x16x16xf32> to vector<16x16xf32>
    %33 = vector.extract_strided_slice %30 {offsets = [1, 0, 0], sizes = [1, 16, 16], strides = [1, 1, 1]} : vector<3x16x16xf32> to vector<1x16x16xf32>
    %34 = vector.shape_cast %33 : vector<1x16x16xf32> to vector<16x16xf32>
    %35 = vector.extract_strided_slice %30 {offsets = [2, 0, 0], sizes = [1, 16, 16], strides = [1, 1, 1]} : vector<3x16x16xf32> to vector<1x16x16xf32>
    %36 = vector.shape_cast %35 : vector<1x16x16xf32> to vector<16x16xf32>
    %cst_16 = arith.constant 2.990000e-01 : f32
    %37 = vector.broadcast %cst_16 : f32 to vector<16x16xf32>
    %38 = arith.mulf %37, %32 : vector<16x16xf32>
    %cst_17 = arith.constant 5.870000e-01 : f32
    %39 = vector.broadcast %cst_17 : f32 to vector<16x16xf32>
    %40 = arith.mulf %39, %34 : vector<16x16xf32>
    %41 = arith.addf %38, %40 : vector<16x16xf32>
    %cst_18 = arith.constant 1.140000e-01 : f32
    %42 = vector.broadcast %cst_18 : f32 to vector<16x16xf32>
    %43 = arith.mulf %42, %36 : vector<16x16xf32>
    %44 = arith.addf %41, %43 : vector<16x16xf32>
    %cst_19 = arith.constant 1.280000e+02 : f32
    %45 = vector.broadcast %cst_19 : f32 to vector<16x16xf32>
    %46 = arith.subf %44, %45 : vector<16x16xf32>
    %cst_20 = arith.constant -1.687360e-01 : f32
    %47 = vector.broadcast %cst_20 : f32 to vector<16x16xf32>
    %48 = arith.mulf %47, %32 : vector<16x16xf32>
    %cst_21 = arith.constant 3.312640e-01 : f32
    %49 = vector.broadcast %cst_21 : f32 to vector<16x16xf32>
    %50 = arith.mulf %49, %34 : vector<16x16xf32>
    %51 = arith.subf %48, %50 : vector<16x16xf32>
    %cst_22 = arith.constant 5.000000e-01 : f32
    %52 = vector.broadcast %cst_22 : f32 to vector<16x16xf32>
    %53 = arith.mulf %52, %36 : vector<16x16xf32>
    %54 = arith.addf %51, %53 : vector<16x16xf32>
    %cst_23 = arith.constant 5.000000e-01 : f32
    %55 = vector.broadcast %cst_23 : f32 to vector<16x16xf32>
    %56 = arith.mulf %55, %32 : vector<16x16xf32>
    %cst_24 = arith.constant 4.186880e-01 : f32
    %57 = vector.broadcast %cst_24 : f32 to vector<16x16xf32>
    %58 = arith.mulf %57, %34 : vector<16x16xf32>
    %59 = arith.subf %56, %58 : vector<16x16xf32>
    %cst_25 = arith.constant 8.131200e-02 : f32
    %60 = vector.broadcast %cst_25 : f32 to vector<16x16xf32>
    %61 = arith.mulf %60, %36 : vector<16x16xf32>
    %62 = arith.subf %59, %61 : vector<16x16xf32>
    %c0_26 = arith.constant 0 : index
    %c0_27 = arith.constant 0 : index
    %63 = vector.load %arg11[%c0_26, %c0_27] : memref<16x16xf32, #tpu.memory_space<vmem>>, vector<16x16xf32>
    %c0_28 = arith.constant 0 : index
    %c0_29 = arith.constant 0 : index
    %64 = vector.load %arg12[%c0_28, %c0_29] : memref<16x16xf32, #tpu.memory_space<vmem>>, vector<16x16xf32>
    %c0_30 = arith.constant 0 : index
    %c0_31 = arith.constant 0 : index
    %65 = vector.load %arg12[%c0_30, %c0_31] : memref<16x16xf32, #tpu.memory_space<vmem>>, vector<16x16xf32>
    %c0_32 = arith.constant 0 : index
    %c0_33 = arith.constant 0 : index
    %66 = vector.load %arg13[%c0_32, %c0_33] : memref<16x16xf32, #tpu.memory_space<vmem>>, vector<16x16xf32>
    %c0_34 = arith.constant 0 : index
    %c0_35 = arith.constant 0 : index
    %67 = vector.load %arg14[%c0_34, %c0_35] : memref<16x16xf32, #tpu.memory_space<vmem>>, vector<16x16xf32>
    %c0_36 = arith.constant 0 : index
    %c0_37 = arith.constant 0 : index
    %68 = vector.load %arg14[%c0_36, %c0_37] : memref<16x16xf32, #tpu.memory_space<vmem>>, vector<16x16xf32>
    %c0_38 = arith.constant 0 : index
    %c0_39 = arith.constant 0 : index
    %69 = vector.load %arg5[%c0_38, %c0_39] : memref<16x16xbf16, #tpu.memory_space<vmem>>, vector<16x16xbf16>
    %c0_40 = arith.constant 0 : index
    %c0_41 = arith.constant 0 : index
    %70 = vector.load %arg6[%c0_40, %c0_41] : memref<16x16xbf16, #tpu.memory_space<vmem>>, vector<16x16xbf16>
    %c0_42 = arith.constant 0 : index
    %c0_43 = arith.constant 0 : index
    %71 = vector.load %arg7[%c0_42, %c0_43] : memref<16x16xbf16, #tpu.memory_space<vmem>>, vector<16x16xbf16>
    %c0_44 = arith.constant 0 : index
    %c0_45 = arith.constant 0 : index
    %72 = vector.load %arg8[%c0_44, %c0_45] : memref<16x16xbf16, #tpu.memory_space<vmem>>, vector<16x16xbf16>
    %73 = arith.truncf %46 : vector<16x16xf32> to vector<16x16xbf16>
    %cst_46 = arith.constant dense<0.000000e+00> : vector<16x16xf32>
    %74 = tpu.matmul %69, %73, %cst_46 {dimension_numbers = #tpu.dot_dimension_numbers<[1], [0], [0], [1], [0, 0, 1, 1], [], []>} : vector<16x16xbf16>, vector<16x16xbf16>, vector<16x16xf32> -> vector<16x16xf32>
    %75 = arith.truncf %74 : vector<16x16xf32> to vector<16x16xbf16>
    %cst_47 = arith.constant dense<0.000000e+00> : vector<16x16xf32>
    %76 = tpu.matmul %75, %71, %cst_47 {dimension_numbers = #tpu.dot_dimension_numbers<[1], [0], [0], [1], [0, 0, 1, 1], [], []>} : vector<16x16xbf16>, vector<16x16xbf16>, vector<16x16xf32> -> vector<16x16xf32>
    %77 = arith.mulf %76, %66 : vector<16x16xf32>
    %78 = math.roundeven %77 : vector<16x16xf32>
    %79 = arith.subf %77, %78 : vector<16x16xf32>
    %80 = arith.mulf %79, %79 : vector<16x16xf32>
    %81 = arith.mulf %79, %80 : vector<16x16xf32>
    %82 = arith.addf %78, %81 : vector<16x16xf32>
    %83 = arith.mulf %82, %63 : vector<16x16xf32>
    %84 = arith.truncf %83 : vector<16x16xf32> to vector<16x16xbf16>
    %cst_48 = arith.constant dense<0.000000e+00> : vector<16x16xf32>
    %85 = tpu.matmul %70, %84, %cst_48 {dimension_numbers = #tpu.dot_dimension_numbers<[1], [0], [0], [1], [0, 0, 1, 1], [], []>} : vector<16x16xbf16>, vector<16x16xbf16>, vector<16x16xf32> -> vector<16x16xf32>
    %86 = arith.truncf %85 : vector<16x16xf32> to vector<16x16xbf16>
    %cst_49 = arith.constant dense<0.000000e+00> : vector<16x16xf32>
    %87 = tpu.matmul %86, %72, %cst_49 {dimension_numbers = #tpu.dot_dimension_numbers<[1], [0], [0], [1], [0, 0, 1, 1], [], []>} : vector<16x16xbf16>, vector<16x16xbf16>, vector<16x16xf32> -> vector<16x16xf32>
    %88 = arith.truncf %54 : vector<16x16xf32> to vector<16x16xbf16>
    %cst_50 = arith.constant dense<0.000000e+00> : vector<16x16xf32>
    %89 = tpu.matmul %69, %88, %cst_50 {dimension_numbers = #tpu.dot_dimension_numbers<[1], [0], [0], [1], [0, 0, 1, 1], [], []>} : vector<16x16xbf16>, vector<16x16xbf16>, vector<16x16xf32> -> vector<16x16xf32>
    %90 = arith.truncf %89 : vector<16x16xf32> to vector<16x16xbf16>
    %cst_51 = arith.constant dense<0.000000e+00> : vector<16x16xf32>
    %91 = tpu.matmul %90, %71, %cst_51 {dimension_numbers = #tpu.dot_dimension_numbers<[1], [0], [0], [1], [0, 0, 1, 1], [], []>} : vector<16x16xbf16>, vector<16x16xbf16>, vector<16x16xf32> -> vector<16x16xf32>
    %92 = arith.mulf %91, %67 : vector<16x16xf32>
    %93 = math.roundeven %92 : vector<16x16xf32>
    %94 = arith.subf %92, %93 : vector<16x16xf32>
    %95 = arith.mulf %94, %94 : vector<16x16xf32>
    %96 = arith.mulf %94, %95 : vector<16x16xf32>
    %97 = arith.addf %93, %96 : vector<16x16xf32>
    %98 = arith.mulf %97, %64 : vector<16x16xf32>
    %99 = arith.truncf %98 : vector<16x16xf32> to vector<16x16xbf16>
    %cst_52 = arith.constant dense<0.000000e+00> : vector<16x16xf32>
    %100 = tpu.matmul %70, %99, %cst_52 {dimension_numbers = #tpu.dot_dimension_numbers<[1], [0], [0], [1], [0, 0, 1, 1], [], []>} : vector<16x16xbf16>, vector<16x16xbf16>, vector<16x16xf32> -> vector<16x16xf32>
    %101 = arith.truncf %100 : vector<16x16xf32> to vector<16x16xbf16>
    %cst_53 = arith.constant dense<0.000000e+00> : vector<16x16xf32>
    %102 = tpu.matmul %101, %72, %cst_53 {dimension_numbers = #tpu.dot_dimension_numbers<[1], [0], [0], [1], [0, 0, 1, 1], [], []>} : vector<16x16xbf16>, vector<16x16xbf16>, vector<16x16xf32> -> vector<16x16xf32>
    %103 = arith.truncf %62 : vector<16x16xf32> to vector<16x16xbf16>
    %cst_54 = arith.constant dense<0.000000e+00> : vector<16x16xf32>
    %104 = tpu.matmul %69, %103, %cst_54 {dimension_numbers = #tpu.dot_dimension_numbers<[1], [0], [0], [1], [0, 0, 1, 1], [], []>} : vector<16x16xbf16>, vector<16x16xbf16>, vector<16x16xf32> -> vector<16x16xf32>
    %105 = arith.truncf %104 : vector<16x16xf32> to vector<16x16xbf16>
    %cst_55 = arith.constant dense<0.000000e+00> : vector<16x16xf32>
    %106 = tpu.matmul %105, %71, %cst_55 {dimension_numbers = #tpu.dot_dimension_numbers<[1], [0], [0], [1], [0, 0, 1, 1], [], []>} : vector<16x16xbf16>, vector<16x16xbf16>, vector<16x16xf32> -> vector<16x16xf32>
    %107 = arith.mulf %106, %68 : vector<16x16xf32>
    %108 = math.roundeven %107 : vector<16x16xf32>
    %109 = arith.subf %107, %108 : vector<16x16xf32>
    %110 = arith.mulf %109, %109 : vector<16x16xf32>
    %111 = arith.mulf %109, %110 : vector<16x16xf32>
    %112 = arith.addf %108, %111 : vector<16x16xf32>
    %113 = arith.mulf %112, %65 : vector<16x16xf32>
    %114 = arith.truncf %113 : vector<16x16xf32> to vector<16x16xbf16>
    %cst_56 = arith.constant dense<0.000000e+00> : vector<16x16xf32>
    %115 = tpu.matmul %70, %114, %cst_56 {dimension_numbers = #tpu.dot_dimension_numbers<[1], [0], [0], [1], [0, 0, 1, 1], [], []>} : vector<16x16xbf16>, vector<16x16xbf16>, vector<16x16xf32> -> vector<16x16xf32>
    %116 = arith.truncf %115 : vector<16x16xf32> to vector<16x16xbf16>
    %cst_57 = arith.constant dense<0.000000e+00> : vector<16x16xf32>
    %117 = tpu.matmul %116, %72, %cst_57 {dimension_numbers = #tpu.dot_dimension_numbers<[1], [0], [0], [1], [0, 0, 1, 1], [], []>} : vector<16x16xbf16>, vector<16x16xbf16>, vector<16x16xf32> -> vector<16x16xf32>
    %cst_58 = arith.constant 1.280000e+02 : f32
    %118 = vector.broadcast %cst_58 : f32 to vector<16x16xf32>
    %119 = arith.addf %87, %118 : vector<16x16xf32>
    %cst_59 = arith.constant 1.402000e+00 : f32
    %120 = vector.broadcast %cst_59 : f32 to vector<16x16xf32>
    %121 = arith.mulf %120, %117 : vector<16x16xf32>
    %122 = arith.addf %119, %121 : vector<16x16xf32>
    %cst_60 = arith.constant 3.441360e-01 : f32
    %123 = vector.broadcast %cst_60 : f32 to vector<16x16xf32>
    %124 = arith.mulf %123, %102 : vector<16x16xf32>
    %125 = arith.subf %119, %124 : vector<16x16xf32>
    %cst_61 = arith.constant 7.141360e-01 : f32
    %126 = vector.broadcast %cst_61 : f32 to vector<16x16xf32>
    %127 = arith.mulf %126, %117 : vector<16x16xf32>
    %128 = arith.subf %125, %127 : vector<16x16xf32>
    %cst_62 = arith.constant 1.772000e+00 : f32
    %129 = vector.broadcast %cst_62 : f32 to vector<16x16xf32>
    %130 = arith.mulf %129, %102 : vector<16x16xf32>
    %131 = arith.addf %119, %130 : vector<16x16xf32>
    %c0_63 = arith.constant 0 : index
    %c0_64 = arith.constant 0 : index
    %132 = vector.load %arg9[%c0_63, %c0_64] : memref<16x16xf32, #tpu.memory_space<vmem>>, vector<16x16xf32>
    %c0_65 = arith.constant 0 : index
    %c0_66 = arith.constant 0 : index
    %133 = vector.load %arg10[%c0_65, %c0_66] : memref<16x16xf32, #tpu.memory_space<vmem>>, vector<16x16xf32>
    %134 = vector.extract_strided_slice %28 {offsets = [0, 0, 0], sizes = [1, 16, 16], strides = [1, 1, 1]} : vector<3x16x16xf32> to vector<1x16x16xf32>
    %135 = vector.shape_cast %134 : vector<1x16x16xf32> to vector<16x16xf32>
    %cst_67 = arith.constant dense<0.000000e+00> : vector<16x16xf32>
    %136 = tpu.matmul %135, %133, %cst_67 {dimension_numbers = #tpu.dot_dimension_numbers<[1], [0], [0], [1], [0, 0, 1, 1], [], []>} : vector<16x16xf32>, vector<16x16xf32>, vector<16x16xf32> -> vector<16x16xf32>
    %cst_68 = arith.constant dense<0.000000e+00> : vector<16x16xf32>
    %137 = tpu.matmul %132, %136, %cst_68 {dimension_numbers = #tpu.dot_dimension_numbers<[1], [0], [0], [1], [0, 0, 1, 1], [], []>} : vector<16x16xf32>, vector<16x16xf32>, vector<16x16xf32> -> vector<16x16xf32>
    %cst_69 = arith.constant 0.000000e+00 : f32
    %cst_70 = arith.constant 2.550000e+02 : f32
    %138 = vector.broadcast %cst_69 : f32 to vector<16x16xf32>
    %139 = arith.maximumf %138, %122 : vector<16x16xf32>
    %140 = vector.broadcast %cst_70 : f32 to vector<16x16xf32>
    %141 = arith.minimumf %140, %139 : vector<16x16xf32>
    %cst_71 = arith.constant 0.00130588235 : f32
    %142 = vector.broadcast %cst_71 : f32 to vector<16x16xf32>
    %143 = arith.mulf %141, %142 : vector<16x16xf32>
    %144 = arith.addf %143, %137 : vector<16x16xf32>
    %c0_72 = arith.constant 0 : index
    %c0_73 = arith.constant 0 : index
    %c0_74 = arith.constant 0 : index
    %c0_75 = arith.constant 0 : index
    %145 = vector.load %arg15[%c0_72, %c0_73, %c0_74, %c0_75] : memref<1x3x16x16xf32, #tpu.memory_space<vmem>>, vector<1x1x16x16xf32>
    %146 = vector.shape_cast %145 : vector<1x1x16x16xf32> to vector<16x16xf32>
    %147 = vector.shape_cast %144 : vector<16x16xf32> to vector<1x1x16x16xf32>
    tpu.vector_store %arg15[%c0_72, %c0_73, %c0_74, %c0_75], %147 {strides = array<i32>} : memref<1x3x16x16xf32, #tpu.memory_space<vmem>>, vector<1x1x16x16xf32>,
    %148 = vector.extract_strided_slice %28 {offsets = [1, 0, 0], sizes = [1, 16, 16], strides = [1, 1, 1]} : vector<3x16x16xf32> to vector<1x16x16xf32>
    %149 = vector.shape_cast %148 : vector<1x16x16xf32> to vector<16x16xf32>
    %cst_76 = arith.constant dense<0.000000e+00> : vector<16x16xf32>
    %150 = tpu.matmul %149, %133, %cst_76 {dimension_numbers = #tpu.dot_dimension_numbers<[1], [0], [0], [1], [0, 0, 1, 1], [], []>} : vector<16x16xf32>, vector<16x16xf32>, vector<16x16xf32> -> vector<16x16xf32>
    %cst_77 = arith.constant dense<0.000000e+00> : vector<16x16xf32>
    %151 = tpu.matmul %132, %150, %cst_77 {dimension_numbers = #tpu.dot_dimension_numbers<[1], [0], [0], [1], [0, 0, 1, 1], [], []>} : vector<16x16xf32>, vector<16x16xf32>, vector<16x16xf32> -> vector<16x16xf32>
    %cst_78 = arith.constant 0.000000e+00 : f32
    %cst_79 = arith.constant 2.550000e+02 : f32
    %152 = vector.broadcast %cst_78 : f32 to vector<16x16xf32>
    %153 = arith.maximumf %152, %128 : vector<16x16xf32>
    %154 = vector.broadcast %cst_79 : f32 to vector<16x16xf32>
    %155 = arith.minimumf %154, %153 : vector<16x16xf32>
    %cst_80 = arith.constant 0.00130588235 : f32
    %156 = vector.broadcast %cst_80 : f32 to vector<16x16xf32>
    %157 = arith.mulf %155, %156 : vector<16x16xf32>
    %158 = arith.addf %157, %151 : vector<16x16xf32>
    %c0_81 = arith.constant 0 : index
    %c1 = arith.constant 1 : index
    %c0_82 = arith.constant 0 : index
    %c0_83 = arith.constant 0 : index
    %159 = vector.load %arg15[%c0_81, %c1, %c0_82, %c0_83] : memref<1x3x16x16xf32, #tpu.memory_space<vmem>>, vector<1x1x16x16xf32>
    %160 = vector.shape_cast %159 : vector<1x1x16x16xf32> to vector<16x16xf32>
    %161 = vector.shape_cast %158 : vector<16x16xf32> to vector<1x1x16x16xf32>
    tpu.vector_store %arg15[%c0_81, %c1, %c0_82, %c0_83], %161 {strides = array<i32>} : memref<1x3x16x16xf32, #tpu.memory_space<vmem>>, vector<1x1x16x16xf32>,
    %162 = vector.extract_strided_slice %28 {offsets = [2, 0, 0], sizes = [1, 16, 16], strides = [1, 1, 1]} : vector<3x16x16xf32> to vector<1x16x16xf32>
    %163 = vector.shape_cast %162 : vector<1x16x16xf32> to vector<16x16xf32>
    %cst_84 = arith.constant dense<0.000000e+00> : vector<16x16xf32>
    %164 = tpu.matmul %163, %133, %cst_84 {dimension_numbers = #tpu.dot_dimension_numbers<[1], [0], [0], [1], [0, 0, 1, 1], [], []>} : vector<16x16xf32>, vector<16x16xf32>, vector<16x16xf32> -> vector<16x16xf32>
    %cst_85 = arith.constant dense<0.000000e+00> : vector<16x16xf32>
    %165 = tpu.matmul %132, %164, %cst_85 {dimension_numbers = #tpu.dot_dimension_numbers<[1], [0], [0], [1], [0, 0, 1, 1], [], []>} : vector<16x16xf32>, vector<16x16xf32>, vector<16x16xf32> -> vector<16x16xf32>
    %cst_86 = arith.constant 0.000000e+00 : f32
    %cst_87 = arith.constant 2.550000e+02 : f32
    %166 = vector.broadcast %cst_86 : f32 to vector<16x16xf32>
    %167 = arith.maximumf %166, %131 : vector<16x16xf32>
    %168 = vector.broadcast %cst_87 : f32 to vector<16x16xf32>
    %169 = arith.minimumf %168, %167 : vector<16x16xf32>
    %cst_88 = arith.constant 0.00130588235 : f32
    %170 = vector.broadcast %cst_88 : f32 to vector<16x16xf32>
    %171 = arith.mulf %169, %170 : vector<16x16xf32>
    %172 = arith.addf %171, %165 : vector<16x16xf32>
    %c0_89 = arith.constant 0 : index
    %c2 = arith.constant 2 : index
    %c0_90 = arith.constant 0 : index
    %c0_91 = arith.constant 0 : index
    %173 = vector.load %arg15[%c0_89, %c2, %c0_90, %c0_91] : memref<1x3x16x16xf32, #tpu.memory_space<vmem>>, vector<1x1x16x16xf32>
    %174 = vector.shape_cast %173 : vector<1x1x16x16xf32> to vector<16x16xf32>
    %175 = vector.shape_cast %172 : vector<16x16xf32> to vector<1x1x16x16xf32>
    tpu.vector_store %arg15[%c0_89, %c2, %c0_90, %c0_91], %175 {strides = array<i32>} : memref<1x3x16x16xf32, #tpu.memory_space<vmem>>, vector<1x1x16x16xf32>,
    return
  }
  func.func @transform_0(%arg0: i32, %arg1: i32) -> (i32, i32, i32, i32) {
    %c0_i32 = arith.constant 0 : i32
    %c0_i32_0 = arith.constant 0 : i32
    %c0_i32_1 = arith.constant 0 : i32
    return %arg0, %arg1, %c0_i32, %c0_i32_0 : i32, i32, i32, i32
  }
  func.func @transform_1(%arg0: i32, %arg1: i32) -> (i32, i32, i32, i32) {
    %c1_i32 = arith.constant 1 : i32
    %0 = arith.subi %arg1, %c1_i32 : i32
    %c0_i32 = arith.constant 0 : i32
    %1 = arith.maxsi %0, %c0_i32 : i32
    %c0_i32_0 = arith.constant 0 : i32
    %c0_i32_1 = arith.constant 0 : i32
    %c0_i32_2 = arith.constant 0 : i32
    return %arg0, %1, %c0_i32_0, %c0_i32_1 : i32, i32, i32, i32
  }
  func.func @transform_2(%arg0: i32, %arg1: i32) -> (i32, i32, i32, i32) {
    %c1_i32 = arith.constant 1 : i32
    %0 = arith.addi %arg1, %c1_i32 : i32
    %c3_i32 = arith.constant 3 : i32
    %1 = arith.minsi %0, %c3_i32 : i32
    %c0_i32 = arith.constant 0 : i32
    %c0_i32_0 = arith.constant 0 : i32
    %c0_i32_1 = arith.constant 0 : i32
    return %arg0, %1, %c0_i32, %c0_i32_0 : i32, i32, i32, i32
  }
  func.func @transform_3(%arg0: i32, %arg1: i32) -> (i32, i32) {
    %c0_i32 = arith.constant 0 : i32
    %c0_i32_0 = arith.constant 0 : i32
    %c0_i32_1 = arith.constant 0 : i32
    return %c0_i32, %c0_i32_0 : i32, i32
  }
  func.func @transform_4(%arg0: i32, %arg1: i32) -> (i32, i32) {
    %c0_i32 = arith.constant 0 : i32
    %c0_i32_0 = arith.constant 0 : i32
    %c0_i32_1 = arith.constant 0 : i32
    return %c0_i32, %c0_i32_0 : i32, i32
  }
  func.func @transform_5(%arg0: i32, %arg1: i32) -> (i32, i32) {
    %c0_i32 = arith.constant 0 : i32
    %c0_i32_0 = arith.constant 0 : i32
    %c0_i32_1 = arith.constant 0 : i32
    return %c0_i32, %c0_i32_0 : i32, i32
  }
  func.func @transform_6(%arg0: i32, %arg1: i32) -> (i32, i32) {
    %c0_i32 = arith.constant 0 : i32
    %c0_i32_0 = arith.constant 0 : i32
    %c0_i32_1 = arith.constant 0 : i32
    return %c0_i32, %c0_i32_0 : i32, i32
  }
  func.func @transform_7(%arg0: i32, %arg1: i32) -> (i32, i32) {
    %c0_i32 = arith.constant 0 : i32
    %c0_i32_0 = arith.constant 0 : i32
    %c0_i32_1 = arith.constant 0 : i32
    return %c0_i32, %c0_i32_0 : i32, i32
  }
  func.func @transform_8(%arg0: i32, %arg1: i32) -> (i32, i32) {
    %c0_i32 = arith.constant 0 : i32
    %c0_i32_0 = arith.constant 0 : i32
    %c0_i32_1 = arith.constant 0 : i32
    return %c0_i32, %c0_i32_0 : i32, i32
  }
  func.func @transform_9(%arg0: i32, %arg1: i32) -> (i32, i32) {
    %c0_i32 = arith.constant 0 : i32
    %c0_i32_0 = arith.constant 0 : i32
    %c0_i32_1 = arith.constant 0 : i32
    return %c0_i32, %c0_i32_0 : i32, i32
  }
  func.func @transform_10(%arg0: i32, %arg1: i32) -> (i32, i32) {
    %c0_i32 = arith.constant 0 : i32
    %c0_i32_0 = arith.constant 0 : i32
    %c0_i32_1 = arith.constant 0 : i32
    return %c0_i32, %c0_i32_0 : i32, i32
  }
  func.func @transform_11(%arg0: i32, %arg1: i32) -> (i32, i32) {
    %c0_i32 = arith.constant 0 : i32
    %c0_i32_0 = arith.constant 0 : i32
    %c0_i32_1 = arith.constant 0 : i32
    return %c0_i32, %c0_i32_0 : i32, i32
  }
  func.func @transform_12(%arg0: i32, %arg1: i32) -> (i32, i32) {
    %c0_i32 = arith.constant 0 : i32
    %c0_i32_0 = arith.constant 0 : i32
    %c0_i32_1 = arith.constant 0 : i32
    return %c0_i32, %c0_i32_0 : i32, i32
  }
  func.func @transform_13(%arg0: i32, %arg1: i32) -> (i32, i32, i32, i32) {
    %c0_i32 = arith.constant 0 : i32
    %c0_i32_0 = arith.constant 0 : i32
    %c0_i32_1 = arith.constant 0 : i32
    return %arg0, %arg1, %c0_i32, %c0_i32_0 : i32, i32, i32, i32
  }
}

</mosaic_0001>

<bundles_post_ra>
// kernel: compress_simulator.1
= control target key start
LH: loop header
LB: loop body
LE: loop exit
PB: predicated region body
PF: predicated region fallthrough
CT: control target
= control target key end

     0   :  { %s2897_s0 = inlined_call_operand.vmem [shape: f32[2,12,16,16], index: 0, kind: input, shape index: {}, may-alias: {0,1,2}]   ;;  %s2898_s1 = inlined_call_operand.vmem [shape: f32[2,12,16,16], index: 1, kind: input, shape index: {}, may-alias: {0,1,2}]   ;;  %s2899_s2 = inlined_call_operand.vmem [shape: f32[2,12,16,16], index: 2, kind: input, shape index: {}, may-alias: {0,1,2}]   ;;  %s2900_s3 = inlined_call_operand.vmem [shape: bf16[16,16], index: 3, kind: input, shape index: {}, may-alias: {3,6}]   ;;  %s2901_s4 = inlined_call_operand.vmem [shape: bf16[16,16], index: 4, kind: input, shape index: {}, may-alias: {4,5}]   ;;  %s2902_s5 = inlined_call_operand.vmem [shape: bf16[16,16], index: 5, kind: input, shape index: {}, may-alias: {4,5}]   ;;  %s2903_s6 = inlined_call_operand.vmem [shape: bf16[16,16], index: 6, kind: input, shape index: {}, may-alias: {3,6}]   ;;  %s2904_s7 = inlined_call_operand.vmem [shape: f32[16,16], index: 7, kind: input, shape index: {}, may-alias: {7,8}]   ;;  %s2905_s8 = inlined_call_operand.vmem [shape: f32[16,16], index: 8, kind: input, shape index: {}, may-alias: {7,8}]   ;;  %s2906_s9 = inlined_call_operand.vmem [shape: f32[16,16], index: 9, kind: input, shape index: {}]   ;;  %s2907_s10 = inlined_call_operand.vmem [shape: f32[16,16], index: 10, kind: input, shape index: {}]   ;;  %s2908_s11 = inlined_call_operand.vmem [shape: f32[16,16], index: 11, kind: input, shape index: {}]   ;;  %s2909_s12 = inlined_call_operand.vmem [shape: f32[16,16], index: 12, kind: input, shape index: {}]   ;;  %s2910_s13 = inlined_call_operand.hbm [shape: f32[2,12,16,16], index: 13, kind: output, shape index: {}]  }
   0x1   :  { %2915 = sst [smem:[#allocation10_spill]] %s2897_s0 }
   0x2   :  { %2916 = sst [smem:[#allocation11_spill]] %s2900_s3 }
   0x3   :  { %2917 = sst [smem:[#allocation12_spill]] %s2901_s4 }
   0x4   :  { %2918 = sst [smem:[#allocation13_spill]] %s2902_s5 }
   0x5   :  { %2919 = sst [smem:[#allocation14_spill]] %s2903_s6 }
   0x6   :  { %2920 = sst [smem:[#allocation15_spill]] %s2905_s8 }
   0x7   :  { %18 = vsyncpa [#allocation3], 0 }
   0x8   :  { %20 = vsyncpa [#allocation3 + $0x1], 0  ;;  %s2495_s25 = smov 0   ;;  %s2497_s26 = smov 0  }
   0x9   :  { %s2499_s27 = smov 0   ;;  %s2501_s28 = smov 0  }
   0xa   :  { %s2503_s29 = smov 0   ;;  %s2505_s30 = smov 0  }
   0xb   :  { %s2507_s14 = smov 0   ;;  %s2509_s15 = smov 0  }
   0xc LB: > { %2921 = sst [smem:[#allocation5_spill]] %s2410_s30  ;;  %s1997_s16 = sadd.s32 4294967295, %s2418_s15   ;;  %s2418_s15 = sphi %s2509_s15, %s26_s15   ;;  %s2414_s14 = sphi %s2507_s14, %s2942_s14   ;;  %s2410_s30 = sphi %s2505_s30, %s2937_s30   ;;  %s2406_s29 = sphi %s2503_s29, %s2936_s29   ;;  %s2402_s28 = sphi %s2501_s28, %s2935_s28   ;;  %s2398_s27 = sphi %s2499_s27, %s2941_s27   ;;  %s2394_s26 = sphi %s2497_s26, %s2940_s26   ;;  %s2390_s25 = sphi %s2495_s25, %s2939_s25  }
   0xd   : > { %2922 = sst [smem:[#allocation6_spill]] %s2414_s14  ;;  %s1998_s17 = sadd.s32 4294967294, %s2418_s15  }
   0xe   : > { %s35_s18 = sadd.s32 1, %s2410_s30  ;;  %s38_s19 = sadd.s32 1, %s2414_s14 }
   0xf   : > { %p36_p0 = scmp.ge.s32.totalorder %s35_s18, 4  ;;  %p363_p1 = scmp.ne.s32.totalorder %s2398_s27, %s2394_s26 }
  0x10   : > { %p364_p2 = scmp.eq.s32.totalorder %s1997_s16, 7  ;;  %p369_p5 = scmp.ne.s32.totalorder %s2394_s26, %s2390_s25 }
  0x11   : > { %s2944_s18 = smov (%p36_p0, %s35_s18), 0  ;;  %s2946_s19 = smov (!%p36_p0, %s38_s19), %s2414_s14 }
  0x12   : > { %2923 = sst [smem:[#allocation7_spill]] %s2944_s18  ;;  %s349_s20 = ssub.s32 %s2410_s30, %s2944_s18 }
  0x13   : > { %p2546_p3 = por %p364_p2, %p363_p1  ;;  %p40_p4 = scmp.ge.s32.totalorder %s2946_s19, 2 }
  0x14   : > { %p370_p6 = scmp.eq.s32.totalorder %s1998_s17, 7  ;;  %p2003_p7 = scmp.ge.s32.totalorder %s2418_s15, 1 }
  0x15   : > { %s2948_s19 = smov (%p40_p4, %s2946_s19), 0  ;;  %p472_p9 = scmp.lt.s32.totalorder %s2418_s15, 9 }
  0x16   : > { %2925 = sst [smem:[#allocation8_spill]] %s2948_s19  ;;  %p2555_p8 = por %p370_p6, %p369_p5 }
  0x17   : > { %s348_s23 = ssub.s32 %s2414_s14, %s2948_s19  ;;  %s353_s24 = sadd.s32 1, %s2398_s27 }
  0x18   : > { %s350_s16 = sor.u32 %s349_s20, %s348_s23  ;;  %p473_p10 = pnand %p2003_p7, %p472_p9 }
  0x19   : > { %p351_p11 = scmp.eq.s32.totalorder %s350_s16, 0  ;;  %s547_s17 = smul.u32 (!%p473_p10), 3, %s2402_s28  ;;  %v2420_v0 = vmov (!%p473_p10), 0.0   ;;  %vm2421_vm0 = vmmov (!%p473_p10), 0   ;;  %vm740_vm1 = vcmask (!%p473_p10), 130048   ;;  %v722_v44 = vld [vmem:[%s2908_s11] sm:$0xff] (!%p473_p10) }
  0x1a   : > { %476 = sbr.rel (%p473_p10) target bundleno = 1885 (0x75d), region = 72  ;;  %p548_p12 = scmp.lt.s32.totalorder (!%p473_p10), %s2406_s29, 1  ;;  %2098 = vmatprep.subr.bf16.mxu0 (!%p473_p10), %v2420_v0  ;;  %2100 = vmatprep.mubr.msk.bf16.mxu0 (!%p473_p10), %vm2421_vm0, %v2420_v0  ;;  %v723_v46 = vld [vmem:[%s2908_s11 + $0x8] sm:$0xff] (!%p473_p10) }
  0x1b   : > { %s2564_s18 = scalar_select %p351_p11, %s2398_s27, %s353_s24  }
  0x1c   : > { %2104 = vmatprep.subr.bf16.mxu1 (!%p473_p10), %v2420_v0  ;;  %2106 = vmatprep.mubr.msk.bf16.mxu1 (!%p473_p10), %vm2421_vm0, %v2420_v0  ;;  %p550_p13 = scmp.lt.s32.totalorder (!%p473_p10), %s547_s17, 11  ;;  %s2928_s0 = sld [smem:[#allocation10_spill]] (!%p473_p10) }
  0x1d   : > { %2927 = sst [smem:[#allocation9_spill]] %s2564_s18  ;;  %s2929_s3 = sld [smem:[#allocation11_spill]] (!%p473_p10) }
  0x1e   : > { %s2930_s5 = sld [smem:[#allocation13_spill]] (!%p473_p10)  ;;  %s2931_s4 = sld [smem:[#allocation12_spill]] (!%p473_p10) }
  0x1f   : > { %s2932_s6 = sld [smem:[#allocation14_spill]] (!%p473_p10)  ;;  %s2933_s8 = sld [smem:[#allocation15_spill]] (!%p473_p10) }
  0x20   : > { %p600_p5 = scmp.gt.s32.totalorder (!%p473_p10), %s2402_s28, 0  ;;  %p603_p6 = scmp.lt.s32.totalorder (!%p473_p10), %s2402_s28, 3 }
  0x21   : > { %s549_s19 = scalar_select %p548_p12, %s2406_s29, 1 }
  0x22   : > { %s2950_s17 = smov (!%p550_p13, %s547_s17), 11 }
  0x23   : > { %s2575_s20 = smul.u32 24, %s549_s19  ;;  %s2004_s23 = sshll.u32 %s2950_s17, 1  ;;  %v2620_v26 = vld [vmem:[%s2929_s3] sm:$0xff]  }
  0x24   : > { %v2630_v27 = vld [vmem:[%s2930_s5] sm:$0xff]   ;;  %s2006_s17 = sadd.s32 4294967295, %s2402_s28 }
  0x25   : > { %s554_s24 = sadd.s32 %s2575_s20, %s2004_s23  ;;  %2105 = vmatpush3.bf16.msra.mxu1 %v2630_v27  ;;  %p559_p0 = scmp.gt.s32.totalorder %s2006_s17, 0 }
  0x26   : > { %s2005_s16 = sshll.u32 %s554_s24, 3  ;;  %2116 = vmatprep.subr.bf16.mxu1 %v2420_v0  ;;  %s575_s23 = sadd.s32 1, %s2402_s28 }
  0x27   : > { %s556_s18 = scalar_lea.vmem %s2928_s0, %s2005_s16  ;;  %s2952_s17 = smov (!%p559_p0, %s2006_s17), 0 }
  0x28   : > { %v2581_v1 = vld [vmem:[%s556_s18] sm:$0xff]  ;;  %v2583_v2 = vld [vmem:[%s556_s18 + $0x8] sm:$0xff]  ;;  %v2585_v3 = vld [vmem:[%s556_s18 + $0x10] sm:$0xff]  ;;  %p576_p1 = scmp.lt.s32.totalorder %s575_s23, 3  ;;  %s561_s24 = smul.u32 3, %s2952_s17 }
  0x29   : > { %v2587_v4 = vld [vmem:[%s556_s18 + $0x18] sm:$0xff]  ;;  %v2589_v5 = vld [vmem:[%s556_s18 + $0x20] sm:$0xff]  ;;  %v2591_v6 = vld [vmem:[%s556_s18 + $0x28] sm:$0xff]  ;;  %v2594_v7 = vmul.f32 255.0, %v2581_v1  ;;  %v2597_v8 = vmul.f32 255.0, %v2583_v2  ;;  %v2600_v9 = vmul.f32 255.0, %v2585_v3 }
  0x2a   : > { %v2603_v10 = vmul.f32 255.0, %v2587_v4  ;;  %v2606_v11 = vmul.f32 255.0, %v2589_v5  ;;  %v2609_v12 = vmul.f32 255.0, %v2591_v6  ;;  %s2954_s23 = smov (!%p576_p1, %s575_s23), 3  ;;  %p564_p2 = scmp.lt.s32.totalorder %s561_s24, 11 }
  0x2b   : > { %v686_v13 = vmul.f32 0.299, %v2594_v7  ;;  %v687_v14 = vmul.f32 0.299, %v2597_v8  ;;  %v688_v15 = vmul.f32 0.587, %v2600_v9 }
  0x2c   : > { %v689_v16 = vmul.f32 0.587, %v2603_v10  ;;  %v692_v17 = vmul.f32 0.114, %v2606_v11  ;;  %v693_v18 = vmul.f32 0.114, %v2609_v12 }
  0x2d   : > { %v690_v19 = vadd.f32 %v688_v15, %v686_v13  ;;  %v698_v28 = vmul.f32 -0.168736, %v2594_v7  ;;  %v699_v29 = vmul.f32 -0.168736, %v2597_v8  ;;  %v700_v30 = vmul.f32 0.331264, %v2600_v9 }
  0x2e   : > { %v691_v20 = vadd.f32 %v689_v16, %v687_v14  ;;  %v701_v31 = vmul.f32 0.331264, %v2603_v10  ;;  %v704_v34 = vmul.f32 0.5, %v2606_v11  ;;  %v705_v35 = vmul.f32 0.5, %v2609_v12  ;;  %v718_v15 = vld [vmem:[%s2906_s9] sm:$0xff]  ;;  %v719_v16 = vld [vmem:[%s2906_s9 + $0x8] sm:$0xff] }
  0x2f   : > { %v694_v21 = vadd.f32 %v692_v17, %v690_v19  ;;  %v702_v32 = vsub.f32 %v698_v28, %v700_v30  ;;  %s578_s16 = smul.u32 3, %s2954_s23  ;;  %s2956_s24 = smov (!%p564_p2, %s561_s24), 11 }
  0x30   : > { %v695_v22 = vadd.f32 %v693_v18, %v691_v20  ;;  %v703_v33 = vsub.f32 %v699_v29, %v701_v31  ;;  %v2684_v29 = vld [vmem:[%s2909_s12] sm:$0xff]  ;;  %v2689_v31 = vld [vmem:[%s2909_s12 + $0x8] sm:$0xff]  ;;  %s2007_s30 = sshll.u32 %s2956_s24, 1 }
  0x31   : > { %v2011_v23 = vadd.f32 -128.0, %v694_v21  ;;  %v706_v36 = vadd.f32 %v704_v34, %v702_v32  ;;  %v2663_v21 = vld [vmem:[%s2931_s4] sm:$0xff]   ;;  %p581_p4 = scmp.lt.s32.totalorder %s578_s16, 11  ;;  %s568_s14 = sadd.s32 %s2575_s20, %s2007_s30 }
  0x32   : > { %v2012_v24 = vadd.f32 -128.0, %v695_v22  ;;  %v707_v37 = vadd.f32 %v705_v35, %v703_v33  ;;  %s601_s18 = scalar_select %p600_p5, 1, 0 }
  0x33   : > { %s2958_s16 = smov (!%p581_p4, %s578_s16), 11  ;;  %s2008_s0 = sshll.u32 %s568_s14, 3 }
  0x34   : > { %v734_v25 = vpack.c.bf16 %v2012_v24, %v2011_v23  ;;  %v901_v41 = vpack.c.bf16 %v707_v37, %v706_v36  ;;  %s2009_s19 = sshll.u32 %s2958_s16, 1  ;;  %s602_s4 = scvt.s32.f32 %s601_s18 }
  0x35   : > { %s585_s3 = sadd.s32 %s2575_s20, %s2009_s19  ;;  %s2760_s17 = scalar_lea.vmem %s2898_s1, %s2008_s0 }
  0x36   : > { %2099 = vmatpush3.bf16.msra.mxu0 %v734_v25  ;;  %s604_s5 = scalar_select %p603_p6, 1, 0 }
  0x37   : > { %2110 = vmatprep.subr.bf16.mxu0 %v2420_v0  ;;  %s2010_s23 = sshll.u32 %s585_s3, 3  ;;  %s2049_s20 = smul.u32 6, %s2402_s28 }
  0x38   : > { %s605_s24 = scvt.s32.f32 %s604_s5  ;;  %s2766_s14 = scalar_lea.vmem %s2899_s2, %s2010_s23 }
  0x39   : > { %2101 = vmatmul.mubr.msk.bf16.vlgmr.msra.gmra.mrb[0].mxu0 %vm740_vm1, %v2620_v26  ;;  %s2244_s18 = smul.u32 24, %s2406_s29  ;;  %s2422_s0 = smov [#allocation2]  }
  0x3a   : > { %2112 = vmatprep.mubr.msk.bf16.mxu0 %vm2421_vm0, %v2420_v0  ;;  %s2328_s3 = sshll.u32 %s2422_s0, 4  ;;  %s2329_s3 = int_to_ptr.vmem [resolvable:$false] %s2328_s3 }
 0x10c   : > { %v778_v38 = vpop.f32.mrb[0].mxu0 }
 0x10d   : > { %v2102_v39 = vpop.f32.mrb[1].mxu0 }
 0x10e   : > { %v781_v40 = vpop.f32.mrb[2].mxu0 }
 0x10f   : > { %v785_v42 = vpack.c.bf16 %v781_v40, %v778_v38  ;;  %v2103_v43 = vpop.f32.mrb[3].mxu0  ;;  %v708_v40 = vmul.f32 0.5, %v2594_v7  ;;  %v720_v7 = vld [vmem:[%s2907_s10] sm:$0xff] }
 0x110   : > { %v711_v43 = vmul.f32 0.418688, %v2603_v10 }
 0x111   : > { %2107 = vmatmul.mubr.msk.bf16.vlgmr.msra.gmra.mrb[0].mxu1 %vm740_vm1, %v785_v42  ;;  %v710_v42 = vmul.f32 0.418688, %v2600_v9 }
 0x112   : > { %2117 = vmatpush3.bf16.msra.mxu1 %v901_v41  ;;  %2118 = vmatprep.mubr.msk.bf16.mxu1 %vm2421_vm0, %v2420_v0  ;;  %v709_v41 = vmul.f32 0.5, %v2597_v8  ;;  %v721_v8 = vld [vmem:[%s2907_s10 + $0x8] sm:$0xff] }
 0x113   : > { %2128 = vmatprep.subr.bf16.mxu1 %v2420_v0 }
 0x119   : > { %2119 = vmatmul.mubr.msk.bf16.vlgmr.msra.gmra.mrb[4].mxu1 %vm740_vm1, %v2620_v26 }
 0x11a   : > { %2130 = vmatprep.mubr.msk.bf16.mxu1 %vm2421_vm0, %v2420_v0 }
 0x1e4   : > { %v829_v45 = vpop.f32.mrb[0].mxu1 }
 0x1e5   : > { %v836_v47 = vmul.f32 %v829_v45, %v722_v44  ;;  %v2108_v48 = vpop.f32.mrb[1].mxu1 }
 0x1e6   : > { %v832_v49 = vpop.f32.mrb[2].mxu1  ;;  %v712_v48 = vsub.f32 %v708_v40, %v710_v42 }
 0x1e7   : > { %v2238_v50 = vround.rtne.f32 %v836_v47  ;;  %v837_v51 = vmul.f32 %v832_v49, %v723_v46  ;;  %v2109_v52 = vpop.f32.mrb[3].mxu1  ;;  %v713_v49 = vsub.f32 %v709_v41, %v711_v43 }
 0x1e8   : > { %v714_v52 = vmul.f32 0.081312, %v2606_v11  ;;  %v2323_v11 = vld [vmem:[%s2932_s6] sm:$0xff]   ;;  %s544_s6 = sand.u32 1, %s2394_s26  }
 0x1e9   : > { %v840_v53 = vsub.f32 %v836_v47, %v2238_v50  ;;  %v2239_v54 = vround.rtne.f32 %v837_v51  ;;  %s2845_s16 = scalar_lea.sflag [#allocation3], %s544_s6 }
 0x1eb   : > { %v842_v55 = vmul.f32 %v840_v53, %v840_v53  ;;  %v841_v56 = vsub.f32 %v837_v51, %v2239_v54 }
 0x1ec   : > { %v936_v57 = vpop.f32.mrb[4].mxu1 }
 0x1ed   : > { %v844_v58 = vmul.f32 %v842_v55, %v840_v53  ;;  %v843_v59 = vmul.f32 %v841_v56, %v841_v56  ;;  %v2120_v60 = vpop.f32.mrb[5].mxu1  ;;  %v715_v53 = vmul.f32 0.081312, %v2609_v12  ;;  %v716_v55 = vsub.f32 %v712_v48, %v714_v52 }
 0x1ee   : > { %v939_v61 = vpop.f32.mrb[6].mxu1 }
 0x1ef   : > { %v846_v62 = vadd.f32 %v2238_v50, %v844_v58  ;;  %v845_v63 = vmul.f32 %v843_v59, %v841_v56  ;;  %v943_v13 = vpack.c.bf16 %v939_v61, %v936_v57  ;;  %v2121_v14 = vpop.f32.mrb[7].mxu1  ;;  %v717_v56 = vsub.f32 %v713_v49, %v715_v53 }
 0x1f1   : > { %v847_v17 = vadd.f32 %v2239_v54, %v845_v63  ;;  %v848_v18 = vmul.f32 %v846_v62, %v718_v15  ;;  %v1095_v58 = vpack.c.bf16 %v717_v56, %v716_v55  ;;  %v610_v55 = vld [vmem:[%s2760_s17 + $0x20] sm:$0xff]  ;;  %v639_v56 = vmul.f32 0.52201146, %v2583_v2 }
 0x1f3   : > { %v849_v19 = vmul.f32 %v847_v17, %v719_v16 }
 0x1f5   : > { %v850_v20 = vpack.c.bf16 %v849_v19, %v848_v18 }
 0x1f7   : > { %2111 = vmatpush3.bf16.msra.mxu0 %v850_v20 }
 0x1f8   : > { %2122 = vmatprep.subr.bf16.mxu0 %v2420_v0 }
 0x1fa   : > { %2113 = vmatmul.mubr.msk.bf16.vlgmr.msra.gmra.mrb[4].mxu0 %vm740_vm1, %v2663_v21 }
 0x1fb   : > { %2123 = vmatpush3.bf16.msra.mxu0 %v2630_v27  ;;  %2124 = vmatprep.mubr.msk.bf16.mxu0 %vm2421_vm0, %v2420_v0 }
 0x1fc   : > { %2134 = vmatprep.subr.bf16.mxu0 %v2420_v0 }
 0x202   : > { %2125 = vmatmul.mubr.msk.bf16.vlgmr.msra.gmra.mrb[8].mxu0 %vm740_vm1, %v943_v13 }
 0x203   : > { %2136 = vmatprep.mubr.msk.bf16.mxu0 %vm2421_vm0, %v2420_v0  ;;  %2135 = vmatpush3.bf16.msra.mxu0 %v2323_v11 }
 0x204   : > { %2146 = vmatprep.subr.bf16.mxu0 %v2420_v0 }
 0x2cd   : > { %v2675_v22 = vpop.f32.mrb[4].mxu0 }
 0x2ce   : > { %v2114_v23 = vpop.f32.mrb[5].mxu0 }
 0x2cf   : > { %v2677_v24 = vpop.f32.mrb[6].mxu0 }
 0x2d0   : > { %v900_v25 = vpack.c.bf16 %v2677_v24, %v2675_v22  ;;  %v2115_v28 = vpop.f32.mrb[7].mxu0  ;;  %v619_v24 = vld [vmem:[%s2766_s14] sm:$0xff] }
 0x2d5   : > { %v981_v30 = vpop.f32.mrb[8].mxu0 }
 0x2d6   : > { %v988_v32 = vmul.f32 %v981_v30, %v2684_v29  ;;  %v2126_v33 = vpop.f32.mrb[9].mxu0 }
 0x2d7   : > { %v984_v34 = vpop.f32.mrb[10].mxu0 }
 0x2d8   : > { %v2240_v35 = vround.rtne.f32 %v988_v32  ;;  %v989_v36 = vmul.f32 %v984_v34, %v2689_v31  ;;  %v2127_v37 = vpop.f32.mrb[11].mxu0 }
 0x2da   : > { %v992_v38 = vsub.f32 %v988_v32, %v2240_v35  ;;  %v2241_v39 = vround.rtne.f32 %v989_v36 }
 0x2dc   : > { %v994_v44 = vmul.f32 %v992_v38, %v992_v38  ;;  %v993_v45 = vsub.f32 %v989_v36, %v2241_v39 }
 0x2de   : > { %v996_v46 = vmul.f32 %v994_v44, %v992_v38  ;;  %v995_v47 = vmul.f32 %v993_v45, %v993_v45 }
 0x2e0   : > { %v998_v50 = vadd.f32 %v2240_v35, %v996_v46  ;;  %v997_v51 = vmul.f32 %v995_v47, %v993_v45  ;;  %v1346_v45 = vld [vmem:[%s2933_s8 + $0x8] sm:$0xff] }
 0x2e1   : > { %v607_v47 = vld [vmem:[%s2760_s17 + $0x8] sm:$0xff] }
 0x2e2   : > { %v999_v9 = vadd.f32 %v2241_v39, %v997_v51  ;;  %v1000_v10 = vmul.f32 %v998_v50, %v720_v7  ;;  %v638_v50 = vmul.f32 0.52201146, %v2581_v1  ;;  %v608_v51 = vld [vmem:[%s2760_s17 + $0x10] sm:$0xff] }
 0x2e4   : > { %v1001_v54 = vmul.f32 %v999_v9, %v721_v8 }
 0x2e6   : > { %v1002_v57 = vpack.c.bf16 %v1001_v54, %v1000_v10  ;;  %v620_v10 = vld [vmem:[%s2766_s14 + $0x8] sm:$0xff]  ;;  %v621_v54 = vld [vmem:[%s2766_s14 + $0x10] sm:$0xff] }
 0x2e8   : > { %2129 = vmatpush3.bf16.msra.mxu1 %v1002_v57 }
 0x2e9   : > { %2140 = vmatprep.subr.bf16.mxu1 %v2420_v0 }
 0x2eb   : > { %2131 = vmatmul.mubr.msk.bf16.vlgmr.msra.gmra.mrb[8].mxu1 %vm740_vm1, %v2663_v21 }
 0x2ec   : > { %2141 = vmatpush3.bf16.msra.mxu1 %v1095_v58  ;;  %2142 = vmatprep.mubr.msk.bf16.mxu1 %vm2421_vm0, %v2420_v0 }
 0x2ed   : > { %2152 = vmatprep.subr.bf16.mxu1 %v2420_v0 }
 0x2f3   : > { %2143 = vmatmul.mubr.msk.bf16.vlgmr.msra.gmra.mrb[12].mxu1 %vm740_vm1, %v2620_v26 }
 0x2f4   : > { %2154 = vmatprep.mubr.msk.bf16.mxu1 %vm2421_vm0, %v2420_v0 }
 0x3be   : > { %v1037_v12 = vpop.f32.mrb[8].mxu1 }
 0x3bf   : > { %v2132_v59 = vpop.f32.mrb[9].mxu1 }
 0x3c0   : > { %v1040_v60 = vpop.f32.mrb[10].mxu1 }
 0x3c1   : > { %v1044_v61 = vpack.c.bf16 %v1040_v60, %v1037_v12  ;;  %v2133_v62 = vpop.f32.mrb[11].mxu1  ;;  %v640_v60 = vmul.f32 0.52201146, %v2585_v3 }
 0x3c3   : > { %2137 = vmatmul.mubr.msk.bf16.vlgmr.msra.gmra.mrb[12].mxu0 %vm740_vm1, %v1044_v61  ;;  %v622_v61 = vld [vmem:[%s2766_s14 + $0x18] sm:$0xff] }
 0x3c4   : > { %2147 = vmatpush3.bf16.msra.mxu0 %v2630_v27  ;;  %2148 = vmatprep.mubr.msk.bf16.mxu0 %vm2421_vm0, %v2420_v0 }
 0x3c5   : > { %2158 = vmatprep.subr.bf16.mxu0 %v2420_v0 }
 0x3c6   : > { %v1130_v26 = vpop.f32.mrb[12].mxu1 }
 0x3c7   : > { %v2144_v63 = vpop.f32.mrb[13].mxu1 }
 0x3c8   : > { %v1133_v13 = vpop.f32.mrb[14].mxu1  ;;  %v611_v63 = vld [vmem:[%s2760_s17 + $0x28] sm:$0xff] }
 0x3c9   : > { %v1137_v14 = vpack.c.bf16 %v1133_v13, %v1130_v26  ;;  %v2145_v15 = vpop.f32.mrb[15].mxu1  ;;  %v641_v13 = vmul.f32 0.52201146, %v2587_v4 }
 0x3ca   : > { %v668_v15 = vmul.f32 0.333, %v2581_v1 }
 0x3cb   : > { %2149 = vmatmul.mubr.msk.bf16.vlgmr.msra.gmra.mrb[16].mxu0 %vm740_vm1, %v1137_v14  ;;  %v623_v14 = vld [vmem:[%s2766_s14 + $0x20] sm:$0xff] }
 0x3cc   : > { %2159 = vmatpush3.bf16.msra.mxu0 %v2323_v11  ;;  %2160 = vmatprep.mubr.msk.bf16.mxu0 %vm2421_vm0, %v2420_v0 }
 0x496   : > { %v2727_v16 = vpop.f32.mrb[12].mxu0 }
 0x497   : > { %v2138_v17 = vpop.f32.mrb[13].mxu0 }
 0x498   : > { %v2729_v27 = vpop.f32.mrb[14].mxu0 }
 0x499   : > { %v2139_v18 = vpop.f32.mrb[15].mxu0 }
 0x49e   : > { %v1175_v19 = vpop.f32.mrb[16].mxu0 }
 0x49f   : > { %v1182_v20 = vmul.f32 %v1175_v19, %v2684_v29  ;;  %v2150_v23 = vpop.f32.mrb[17].mxu0 }
 0x4a0   : > { %v1178_v28 = vpop.f32.mrb[18].mxu0 }
 0x4a1   : > { %v2242_v30 = vround.rtne.f32 %v1182_v20  ;;  %v1183_v32 = vmul.f32 %v1178_v28, %v2689_v31  ;;  %v2151_v33 = vpop.f32.mrb[19].mxu0  ;;  %v1345_v31 = vld [vmem:[%s2933_s8] sm:$0xff]  ;;  %s2236_s8 = smul.u32 48, %s544_s6 }
 0x4a2   : > { %v2748_v46 = vpack.c.bf16 %v1346_v45, %v1345_v31 }
 0x4a3   : > { %v1186_v34 = vsub.f32 %v1182_v20, %v2242_v30  ;;  %v2243_v35 = vround.rtne.f32 %v1183_v32  ;;  %s546_s19 = scalar_lea.vmem [#allocation2], %s2236_s8 }
 0x4a4   : > { %2213 = vmatprep.subr.bf16.mxu0 %v2748_v46  ;;  %s1870_s28 = sshll.u32 %s546_s19, 4  ;;  %s2834_s28 = int_to_ptr.vmem [resolvable:$true] %s1870_s28 }
 0x4a5   : > { %v1188_v36 = vmul.f32 %v1186_v34, %v1186_v34  ;;  %v1187_v37 = vsub.f32 %v1183_v32, %v2243_v35  ;;  %v624_v32 = vld [vmem:[%s2766_s14 + $0x28] sm:$0xff]  ;;  %s2324_s14 = scalar_lea.vmem %s2834_s28, 768  ;;  %p2331_p11 = scmp.lt.s32.totalorder %s2834_s28, %s2329_s3 }
 0x4a6   : > { %p2325_p7 = scmp.ne.s32.totalorder %s2834_s28, %s2324_s14 }
 0x4a7   : > { %v1190_v38 = vmul.f32 %v1188_v36, %v1186_v34  ;;  %v1189_v39 = vmul.f32 %v1187_v37, %v1187_v37  ;;  %v642_v36 = vmul.f32 0.52201146, %v2589_v5 }
 0x4a8   : > { %p2326_p9 = pnand %p2325_p7, %p2546_p3 }
 0x4a9   : > { %v1192_v40 = vadd.f32 %v2242_v30, %v1190_v38  ;;  %v1191_v41 = vmul.f32 %v1189_v39, %v1187_v37 }
 0x4aa   : > { %p2327_p10 = pneg %p2326_p9 }
 0x4ab   : > { %v1193_v42 = vadd.f32 %v2243_v35, %v1191_v41  ;;  %v1194_v43 = vmul.f32 %v1192_v40, %v720_v7  ;;  %v609_v7 = vld [vmem:[%s2760_s17 + $0x18] sm:$0xff]  ;;  %v643_v40 = vmul.f32 0.52201146, %v2591_v6 }
 0x4ad   : > { %v1195_v44 = vmul.f32 %v1193_v42, %v721_v8 }
 0x4af   : > { %v1196_v29 = vpack.c.bf16 %v1195_v44, %v1194_v43 }
 0x4b1   : > { %2153 = vmatpush3.bf16.msra.mxu1 %v1196_v29 }
 0x4b2   : > { %2164 = vmatprep.subr.bf16.mxu1 %v2420_v0 }
 0x4b4   : > { %2155 = vmatmul.mubr.msk.bf16.vlgmr.msra.gmra.mrb[16].mxu1 %vm740_vm1, %v2663_v21  ;;  %v612_v21 = vstv %s602_s4  ;;  %s2330_s4 = scalar_lea.vmem %s2329_s3, 1536 }
 0x4b5   : > { %2165 = vmatpush3.bf16.msra.mxu1 %v2323_v11  ;;  %2166 = vmatprep.mubr.msk.bf16.mxu1 %vm2421_vm0, %v2420_v0  ;;  %v606_v0 = vld [vmem:[%s2760_s17] sm:$0xff]  ;;  %v614_v52 = vmul.f32 %v612_v21, %v607_v47  ;;  %v615_v53 = vmul.f32 %v612_v21, %v608_v51  ;;  %v616_v58 = vmul.f32 %v612_v21, %v609_v7  ;;  %v670_v51 = vmul.f32 0.333, %v2585_v3  ;;  %s1867_s17 = sadd.s32 %s2244_s18, %s2049_s20  ;;  %p2332_p12 = scmp.lt.s32.totalorder %s2330_s4, %s2324_s14 }
 0x4b6   : > { %v613_v22 = vmul.f32 %v612_v21, %v606_v0  ;;  %v617_v26 = vmul.f32 %v612_v21, %v610_v55  ;;  %v618_v30 = vmul.f32 %v612_v21, %v611_v63  ;;  %v1339_v7 = vmul.f32 1.772, %v2727_v16  ;;  %s2046_s29 = sshll.u32 %s1867_s17, 7 }
 0x4b7   : > { %v633_v57 = vmul.f32 0.23899427, %v614_v52  ;;  %v634_v59 = vmul.f32 0.23899427, %v615_v53  ;;  %v635_v19 = vmul.f32 0.23899427, %v616_v58  ;;  %s2839_s30 = scalar_lea.hbm %s2910_s13, %s2046_s29  ;;  %p2333_p13 = por %p2332_p12, %p2331_p11 }
 0x4b8   : > { %v632_v49 = vmul.f32 0.23899427, %v613_v22  ;;  %v636_v35 = vmul.f32 0.23899427, %v617_v26  ;;  %v637_v43 = vmul.f32 0.23899427, %v618_v30 }
 0x4b9   : > { %v645_v17 = vadd.f32 %v639_v56, %v633_v57  ;;  %v646_v23 = vadd.f32 %v640_v60, %v634_v59  ;;  %v647_v38 = vadd.f32 %v641_v13, %v635_v19  ;;  %v1331_v53 = vmul.f32 0.344136, %v2727_v16  ;;  %p2334_p0 = pnand %p2333_p13, %p2327_p10 }
 0x4ba   : > { %v644_v8 = vadd.f32 %v638_v50, %v632_v49  ;;  %v648_v45 = vadd.f32 %v642_v36, %v636_v35  ;;  %v649_v49 = vadd.f32 %v643_v40, %v637_v43  ;;  %v1340_v59 = vmul.f32 1.772, %v2729_v27  ;;  %v1344_v40 = vld [vmem:[%s2904_s7 + $0x8] sm:$0xff] }
 0x4bb   : > { %v673_v13 = vmul.f32 0.333, %v2591_v6  ;;  %v1343_v6 = vld [vmem:[%s2904_s7] sm:$0xff] }
 0x4bc   : > { %2167 = vmatmul.mubr.msk.bf16.vlgmr.msra.gmra.mrb[20].mxu1 %vm740_vm1, %v900_v25  ;;  %v625_v25 = vstv %s605_s24 }
 0x4bd   : > { %v626_v48 = vmul.f32 %v625_v25, %v619_v24  ;;  %v627_v11 = vmul.f32 %v625_v25, %v620_v10  ;;  %v628_v12 = vmul.f32 %v625_v25, %v621_v54  ;;  %v629_v18 = vmul.f32 %v625_v25, %v622_v61  ;;  %2181 = vmatprep.mubr.msk.f32.mxu1 %vm740_vm1, %v1343_v6 }
 0x4be   : > { %v630_v34 = vmul.f32 %v625_v25, %v623_v14  ;;  %v631_v42 = vmul.f32 %v625_v25, %v624_v32  ;;  %v1332_v10 = vmul.f32 0.344136, %v2729_v27 }
 0x4bf   : > { %v650_v9 = vmul.f32 0.23899427, %v626_v48  ;;  %v651_v20 = vmul.f32 0.23899427, %v627_v11  ;;  %v652_v28 = vmul.f32 0.23899427, %v628_v12 }
 0x4c0   : > { %v653_v39 = vmul.f32 0.23899427, %v629_v18  ;;  %v654_v0 = vmul.f32 0.23899427, %v630_v34  ;;  %v669_v48 = vmul.f32 0.333, %v2583_v2 }
 0x4c1   : > { %v656_v62 = vadd.f32 %v650_v9, %v644_v8  ;;  %v657_v1 = vadd.f32 %v651_v20, %v645_v17  ;;  %v658_v31 = vadd.f32 %v652_v28, %v646_v23  ;;  %v655_v50 = vmul.f32 0.23899427, %v631_v42 }
 0x4c2   : > { %v659_v24 = vadd.f32 %v653_v39, %v647_v38  ;;  %v660_v52 = vadd.f32 %v654_v0, %v648_v45  ;;  %v671_v2 = vmul.f32 0.333, %v2587_v4  ;;  %v672_v12 = vmul.f32 0.333, %v2589_v5 }
 0x4c3   : > { %v662_v33 = vmul.f32 0.333, %v656_v62  ;;  %v663_v47 = vmul.f32 0.333, %v657_v1  ;;  %v664_v25 = vmul.f32 0.333, %v658_v31  ;;  %v661_v57 = vadd.f32 %v655_v50, %v649_v49 }
 0x4c4   : > { %v665_v9 = vmul.f32 0.333, %v659_v24  ;;  %v666_v3 = vmul.f32 0.333, %v660_v52 }
 0x4c5   : > { %v674_v29 = vadd.f32 %v668_v15, %v662_v33  ;;  %v675_v56 = vadd.f32 %v669_v48, %v663_v47  ;;  %v676_v11 = vadd.f32 %v670_v51, %v664_v25  ;;  %v667_v63 = vmul.f32 0.333, %v661_v57 }
 0x4c6   : > { %v677_v26 = vadd.f32 %v671_v2, %v665_v9  ;;  %v678_v5 = vadd.f32 %v672_v12, %v666_v3 }
 0x4c7   : > { %v679_v27 = vadd.f32 %v673_v13, %v667_v63 }
 0x587   : > { %v1231_v37 = vpop.f32.mrb[16].mxu1 }
 0x588   : > { %v2156_v41 = vpop.f32.mrb[17].mxu1 }
 0x589   : > { %v1234_v44 = vpop.f32.mrb[18].mxu1 }
 0x58a   : > { %v1238_v21 = vpack.c.bf16 %v1234_v44, %v1231_v37  ;;  %v2157_v22 = vpop.f32.mrb[19].mxu1 }
 0x58c   : > { %2161 = vmatmul.mubr.msk.bf16.vlgmr.msra.gmra.mrb[20].mxu0 %vm740_vm1, %v1238_v21 }
 0x58d   : > { %2215 = vmatpush3.bf16.msra.mxu0 %v2748_v46  ;;  %2174 = vmatprep.mubr.msk.f32.mxu0 %vm740_vm1, %v674_v29 }
 0x58e   : > { %2221 = vmatprep.subr.bf16.mxu0 %v2748_v46 }
 0x58f   : > { %v1320_v8 = vpop.f32.mrb[20].mxu1 }
 0x590   : > { %v1321_v54 = vadd.f32 128.0, %v1320_v8  ;;  %v2168_v55 = vpop.f32.mrb[21].mxu1 }
 0x591   : > { %v1323_v58 = vpop.f32.mrb[22].mxu1 }
 0x592   : > { %v1333_v16 = vsub.f32 %v1321_v54, %v1331_v53  ;;  %v1324_v60 = vadd.f32 128.0, %v1323_v58  ;;  %v2169_v61 = vpop.f32.mrb[23].mxu1  ;;  %v2798_v62 = vadd.f32 %v1339_v7, %v1321_v54 }
 0x594   : > { %v1334_v4 = vsub.f32 %v1324_v60, %v1332_v10  ;;  %2175 = vmatmul.mubr.msk.f32.vlgmr.msra.gmra.mrb[24].mxu0 %vm740_vm1, %v675_v56  ;;  %v2802_v14 = vadd.f32 %v1340_v59, %v1324_v60  ;;  %v1842_v48 = vmax.f32 %v2798_v62, 0.0 }
 0x595   : > { %2223 = vmatpush3.bf16.msra.mxu0 %v2748_v46  ;;  %2188 = vmatprep.mubr.msk.f32.mxu0 %vm740_vm1, %v676_v11 }
 0x596   : > { %2229 = vmatprep.subr.bf16.mxu0 %v2748_v46  ;;  %v1843_v47 = vmax.f32 %v2802_v14, 0.0  ;;  %v1844_v10 = vmin.f32 %v1842_v48, 255.0 }
 0x598   : > { %2189 = vmatmul.mubr.msk.f32.vlgmr.msra.gmra.mrb[26].mxu0 %vm740_vm1, %v677_v26  ;;  %v1845_v8 = vmin.f32 %v1843_v47, 255.0  ;;  %v1846_v11 = vmul.f32 0.0013058824, %v1844_v10 }
 0x599   : > { %2231 = vmatpush3.bf16.msra.mxu0 %v2748_v46  ;;  %2202 = vmatprep.mubr.msk.f32.mxu0 %vm740_vm1, %v678_v5 }
 0x59a   : > { %v1847_v57 = vmul.f32 0.0013058824, %v1845_v8 }
 0x59c   : > { %2203 = vmatmul.mubr.msk.f32.vlgmr.msra.gmra.mrb[28].mxu0 %vm740_vm1, %v679_v27 }
 0x65f   : > { %v1276_v15 = vpop.f32.mrb[20].mxu0 }
 0x660   : > { %v1327_v17 = vmul.f32 1.402, %v1276_v15  ;;  %v1335_v18 = vmul.f32 0.714136, %v1276_v15  ;;  %v2162_v19 = vpop.f32.mrb[21].mxu0 }
 0x661   : > { %v1279_v20 = vpop.f32.mrb[22].mxu0 }
 0x662   : > { %v1329_v23 = vadd.f32 %v1327_v17, %v1321_v54  ;;  %v1337_v28 = vsub.f32 %v1333_v16, %v1335_v18  ;;  %v1328_v30 = vmul.f32 1.402, %v1279_v20  ;;  %v1336_v32 = vmul.f32 0.714136, %v1279_v20  ;;  %v2163_v46 = vpop.f32.mrb[23].mxu0 }
 0x664   : > { %v1330_v33 = vadd.f32 %v1328_v30, %v1324_v60  ;;  %v1338_v34 = vsub.f32 %v1334_v4, %v1336_v32  ;;  %v1509_v29 = vmax.f32 %v1329_v23, 0.0  ;;  %v1675_v21 = vmax.f32 %v1337_v28, 0.0 }
 0x666   : > { %v1510_v44 = vmax.f32 %v1330_v33, 0.0  ;;  %v1676_v45 = vmax.f32 %v1338_v34, 0.0  ;;  %v1511_v0 = vmin.f32 %v1509_v29, 255.0  ;;  %v1677_v25 = vmin.f32 %v1675_v21, 255.0 }
 0x667   : > { %v2176_v35 = vpop.f32.mrb[24].mxu0 }
 0x668   : > { %v1419_v36 = vpop.f32.mrb[25].mxu0  ;;  %v1512_v31 = vmin.f32 %v1510_v44, 255.0  ;;  %v1678_v24 = vmin.f32 %v1676_v45, 255.0  ;;  %v1513_v50 = vmul.f32 0.0013058824, %v1511_v0 }
 0x669   : > { %v2216_v37 = vpack.c.bf16 %v2176_v35, %v1419_v36  ;;  %v1679_v2 = vmul.f32 0.0013058824, %v1677_v25 }
 0x66a   : > { %v1514_v22 = vmul.f32 0.0013058824, %v1512_v31  ;;  %v1680_v7 = vmul.f32 0.0013058824, %v1678_v24 }
 0x66b   : > { %2217 = vmatprep.subr.bf16.mxu1 %v2216_v37  ;;  %v2190_v38 = vpop.f32.mrb[26].mxu0 }
 0x66c   : > { %2219 = vmatpush3.bf16.msra.mxu1 %v2216_v37  ;;  %v1591_v39 = vpop.f32.mrb[27].mxu0 }
 0x66d   : > { %v2224_v41 = vpack.c.bf16 %v2190_v38, %v1591_v39 }
 0x66f   : > { %2182 = vmatmul.mubr.msk.f32.vlgmr.msra.gmra.mrb[24].mxu1 %vm740_vm1, %v1344_v40  ;;  %2225 = vmatprep.subr.bf16.mxu1 %v2224_v41  ;;  %v2204_v1 = vpop.f32.mrb[28].mxu0 }
 0x670   : > { %2227 = vmatpush3.bf16.msra.mxu1 %v2224_v41  ;;  %v1758_v42 = vpop.f32.mrb[29].mxu0  ;;  %2195 = vmatprep.mubr.msk.f32.mxu1 %vm740_vm1, %v1343_v6 }
 0x671   : > { %v2232_v43 = vpack.c.bf16 %v2204_v1, %v1758_v42 }
 0x673   : > { %2196 = vmatmul.mubr.msk.f32.vlgmr.msra.gmra.mrb[26].mxu1 %vm740_vm1, %v1344_v40  ;;  %2233 = vmatprep.subr.bf16.mxu1 %v2232_v43 }
 0x674   : > { %2235 = vmatpush3.bf16.msra.mxu1 %v2232_v43  ;;  %2209 = vmatprep.mubr.msk.f32.mxu1 %vm740_vm1, %v1343_v6 }
 0x677   : > { %2210 = vmatmul.mubr.msk.f32.vlgmr.msra.gmra.mrb[28].mxu1 %vm740_vm1, %v1344_v40 }
 0x742   : > { %v2183_v49 = vpop.f32.mrb[24].mxu1 }
 0x743   : > { %v1516_v51 = vadd.f32 %v2183_v49, %v1514_v22  ;;  %v1500_v52 = vpop.f32.mrb[25].mxu1 }
 0x744   : > { %v1515_v53 = vadd.f32 %v1513_v50, %v1500_v52 }
 0x745   : > { %1518 = vst.msk [vmem:[%s546_s19 + $0x8] sm:$0xff] %vm740_vm1, %v1516_v51 }
 0x746   : > { %1517 = vst.msk [vmem:[%s546_s19] sm:$0xff] %vm740_vm1, %v1515_v53  ;;  %v2197_v9 = vpop.f32.mrb[26].mxu1 }
 0x747   : > { %v1682_v54 = vadd.f32 %v2197_v9, %v1680_v7  ;;  %v1666_v55 = vpop.f32.mrb[27].mxu1 }
 0x748   : > { %v1681_v56 = vadd.f32 %v1679_v2, %v1666_v55 }
 0x749   : > { %2038 = vst.msk [vmem:[%s546_s19 + $0x18] sm:$0xff] %vm740_vm1, %v1682_v54 }
 0x74a   : > { %2037 = vst.msk [vmem:[%s546_s19 + $0x10] sm:$0xff] %vm740_vm1, %v1681_v56  ;;  %v2211_v58 = vpop.f32.mrb[28].mxu1 }
 0x74b   : > { %v1849_v3 = vadd.f32 %v2211_v58, %v1847_v57  ;;  %v1833_v12 = vpop.f32.mrb[29].mxu1 }
 0x74c   : > { %v1848_v59 = vadd.f32 %v1846_v11, %v1833_v12 }
 0x74d   : > { %2044 = vst.msk [vmem:[%s546_s19 + $0x28] sm:$0xff] %vm740_vm1, %v1849_v3 }
 0x74e   : > { %2043 = vst.msk [vmem:[%s546_s19 + $0x20] sm:$0xff] %vm740_vm1, %v1848_v59 }
 0x74f   : > { %2337 = shalt.err (!%p2334_p0)
}
 0x750   : > { %s2338_s5 = scalar_lea.hbm %s2839_s30, 768  ;;  %s2342_s20 = scalar_lea.hbm %s2910_s13, 6144 }
 0x751   : > { %p2339_p1 = scmp.ne.s32.totalorder %s2839_s30, %s2338_s5  ;;  %p2343_p5 = scmp.lt.u32.totalorder %s2839_s30, %s2910_s13 }
 0x752   : > { %p2344_p6 = scmp.lt.u32.totalorder %s2342_s20, %s2338_s5  ;;  %p2346_p9 = scmp.lt.u32.totalorder %s2338_s5, %s2839_s30 }
 0x753   : > { %p2340_p2 = pnand %p2339_p1, %p2546_p3 }
 0x754   : > { %p2345_p7 = por %p2344_p6, %p2343_p5 }
 0x755   : > { %p2341_p4 = pneg %p2340_p2 }
 0x756   : > { %p2347_p10 = por %p2346_p9, %p2345_p7 }
 0x758   : > { %p2348_p11 = pnand %p2347_p10, %p2341_p4 }
 0x75a   : > { %2351 = shalt.err (!%p2348_p11)
}
 0x75b   : > { %s2423_s17 = smov 128   ;;  %s2424_s29 = smov 8  }
 0x75c   : > { %2245 = dma.vmem_to_hbm [thread:$0]  (%p2546_p3), %s2834_s28, 768, %s2839_s30, %s2845_s16, %s2423_s17, %s2423_s17, %s2424_s29  }
 0x75d PF: > { %p2251_p12 = scmp.ge.s32.totalorder %s2418_s15, 2  ;;  %s1885_s23 = sand.u32 1, %s2390_s25  }
 0x75e   : > { %s1886_s24 = scalar_lea.sflag [#allocation3], %s1885_s23 }
 0x75f   : > { %p2248_p13 = pnand %p2251_p12, %p2555_p8 }
 0x761   : > { %2385 = dma.done.wait (!%p2248_p13), %s1886_s24, 768  }
 0x762   : > { %2387 = vsyncadd (!%p2248_p13), %s1886_s24, 4294966528  ;;  %s26_s15 = sadd.s32 1, %s2418_s15   ;;  %s2934_s14 = sld [smem:[#allocation9_spill]] }
 0x763   : > { %p23_p0 = scmp.ge.s32.totalorder %s26_s15, 10   ;;  %s2935_s28 = sld [smem:[#allocation5_spill]] }
 0x764   : > { %s2936_s29 = sld [smem:[#allocation6_spill]]  ;;  %s2937_s30 = sld [smem:[#allocation7_spill]] }
 0x765   : > { %s2938_s21 = sld [smem:[#allocation8_spill]]  ;;  %s2939_s25 = smov %s2394_s26 }
 0x766   : > { %s2940_s26 = smov %s2398_s27  ;;  %25 = sbr.rel (!%p23_p0) target bundleno = 12 (0xc), region = 115 }
 0x768   : > { %s2941_s27 = smov %s2934_s14 }
 0x76b   : > { %s2942_s14 = smov %s2938_s21 }
 0x76d   :  { %1891 = vsyncpa [#allocation3], 1 }
 0x76e   :  { %1893 = vsyncpa [#allocation3 + $0x1], 1 }

</bundles_post_ra>
